<compile_context>
chip_gen: v7x
topology: tpu7x:2x2x1
jax: 0.10.0
libtpu: 0.0.40
codegen_flags: <defaults>
</compile_context>

<pallas_src>
import jax
import jax.numpy as jnp
from jax.experimental import pallas as pl
from jax.experimental.pallas import tpu as pltpu


# ---------------------------------------------------------------------------
# Fused kernel: subnets (block-diag matmul) + ReLU + fc1 + ReLU + fc2
# ---------------------------------------------------------------------------
def _fused_kernel(x_ref, wbd_ref, bcat_ref, w1_ref, b1_ref, w2_ref, b2_ref,
                  o_ref):
    # x_ref  : (Bt, S*D)    bf16 flattened inputs for this batch tile
    # wbd_ref: (S*D, Tp)    bf16 block-diagonal subnet weights (Tp = padded 256)
    # bcat_ref:(1, Tp)      f32 concatenated subnet biases (padding = 0)
    # w1_ref : (Tp, Hf)     bf16 fc1 weight (padded rows = 0), b1_ref: (1, Hf) f32
    # w2_ref : (1, Hf)      f32 fc2 weight as a lane row
    # b2_ref : (1, 1)       f32 fc2 bias in SMEM
    # o_ref  : (Bt, 1)      f32
    h = jnp.dot(x_ref[...], wbd_ref[...], preferred_element_type=jnp.float32)
    h = jnp.maximum(h + bcat_ref[...], 0.0)                     # (Bt, Tp) f32

    h2 = jnp.dot(h.astype(jnp.bfloat16), w1_ref[...],
                 preferred_element_type=jnp.float32)
    h2 = jnp.maximum(h2 + b1_ref[...], 0.0)                     # (Bt, Hf) f32

    # fc2: N=1 -> VPU mul + XLU lane reduce (avoids a ~fully masked MXU pass)
    o_ref[...] = (jnp.sum(h2 * w2_ref[...], axis=-1, keepdims=True)
                  + b2_ref[0, 0])


# ---------------------------------------------------------------------------
# Batch tiling policy
# ---------------------------------------------------------------------------
def _choose_batch_tile(B):
    """Largest tile that amortizes ~0.35us/step while guaranteeing >=2 grid
    steps for large B (so v7x can shard the 'parallel' batch axis across its
    two TensorCores)."""
    if B <= 256:
        return B                              # single step; latency-bound anyway
    tile = min(512, -(-B // 2))               # >= 2 steps, cap at 512 rows
    return max(8, (tile // 8) * 8)            # keep the sublane dim 8-aligned


# ---------------------------------------------------------------------------
# Wrapper
# ---------------------------------------------------------------------------
def multiview_forward(inputs, params):
    """inputs: (B, 24, D) float32 -> (B, 1) float32 (matches torch forward)."""
    B, S, D = inputs.shape
    # contiguous reshape (free) + bf16 cast for the MXU / halved DMA bytes
    x_flat = inputs.reshape(B, S * D).astype(jnp.bfloat16)

    w_bd = params["w_bd"]                     # (S*D, Tp) bf16
    b_cat = params["b_cat"]                   # (1, Tp)   f32
    fc1_w = params["fc1_w_p"]                 # (Tp, Hf)  bf16
    fc1_b = params["fc1_b"]                   # (1, Hf)   f32
    fc2_w_row = params["fc2_w_row"]           # (1, Hf)   f32
    fc2_b = params["fc2_b"]                   # (1, 1)    f32
    total_p = w_bd.shape[1]
    Hf = fc1_w.shape[1]

    b_tile = _choose_batch_tile(B)
    grid = (pl.cdiv(B, b_tile),)

    def build(single_buffer_weights):
        def wspec(shape):
            # grid-invariant operands: constant index_map every step
            idx = lambda i, _n=len(shape): (0,) * _n
            if single_buffer_weights:
                return pl.BlockSpec(shape, idx, pipeline_mode=pl.Buffered(1))
            return pl.BlockSpec(shape, idx)

        return pl.pallas_call(
            _fused_kernel,
            out_shape=jax.ShapeDtypeStruct((B, 1), jnp.float32),
            grid=grid,
            in_specs=[
                pl.BlockSpec((b_tile, S * D), lambda i: (i, 0)),    # x tile
                wspec((S * D, total_p)),                            # W_bd
                wspec((1, total_p)),                                # b_cat
                wspec((total_p, Hf)),                               # fc1_w
                wspec((1, Hf)),                                     # fc1_b
                wspec((1, Hf)),                                     # fc2_w row
                pl.BlockSpec(memory_space=pltpu.MemorySpace.SMEM),  # fc2_b scalar
            ],
            out_specs=pl.BlockSpec((b_tile, 1), lambda i: (i, 0)),
            compiler_params=pltpu.CompilerParams(
                dimension_semantics=("parallel",),
                # no vmem_limit_bytes override: footprint <2 MiB; default scoped
                # limit is plenty and leaves headroom on v7x (64 MiB physical).
            ),
        )

    args = (x_flat, w_bd, b_cat, fc1_w, fc1_b, fc2_w_row, fc2_b)
    try:
        # constant-index operands single-buffered (double-buffering them only
        # duplicates VMEM with zero overlap benefit)
        return build(True)(*args)
    except Exception:
        # pl.Buffered(1) unsupported on this jax/libtpu combo: default double
        # buffering is functionally identical, just a few hundred KiB more VMEM.
        return build(False)(*args)


# ---------------------------------------------------------------------------
# Deterministic parameter construction (shapes mirror the torch __init__)
# ---------------------------------------------------------------------------
def make_params(key, embedding_dim, fc_cur, conv_cur, fc_hist, conv_hist,
                num_final_hidden):
    hidden_sizes = (
        [fc_cur] * 2 + [conv_cur] * 10 + [fc_hist] * 2 + [conv_hist] * 10
    )
    S = len(hidden_sizes)                     # 24
    D = embedding_dim
    total = sum(hidden_sizes)                 # 216 at the demo sizes
    total_p = ((total + 127) // 128) * 128    # lane-align the concat axis -> 256
    Hf = num_final_hidden

    keys = jax.random.split(key, 2 * S + 4)

    # per-subnet weights (kept in f32 for the pure-JAX reference)
    w_list, b_list = [], []
    for i, h in enumerate(hidden_sizes):
        w = jax.random.normal(keys[2 * i], (D, h), jnp.float32) * (1.0 / D) ** 0.5
        b = jax.random.normal(keys[2 * i + 1], (h,), jnp.float32) * 0.05
        w_list.append(w)
        b_list.append(b)

    # fused forms: exact block-diagonal, zero-padded columns up to total_p
    # (zeros through the ReLU + zero fc1 rows -> bit-identical results)
    w_bd = jnp.zeros((S * D, total_p), jnp.float32)
    off = 0
    for i, h in enumerate(hidden_sizes):
        w_bd = w_bd.at[i * D:(i + 1) * D, off:off + h].set(w_list[i])
        off += h
    b_cat = jnp.zeros((1, total_p), jnp.float32)
    b_cat = b_cat.at[0, :total].set(jnp.concatenate(b_list))

    fc1_w = jax.random.normal(keys[-4], (total, Hf),
                              jnp.float32) * (1.0 / total) ** 0.5
    fc1_b = jax.random.normal(keys[-3], (1, Hf), jnp.float32) * 0.05
    fc2_w = jax.random.normal(keys[-2], (Hf, 1),
                              jnp.float32) * (1.0 / Hf) ** 0.5
    fc2_b = jax.random.normal(keys[-1], (1, 1), jnp.float32) * 0.05

    fc1_w_p = jnp.zeros((total_p, Hf), jnp.float32).at[:total, :].set(fc1_w)

    return dict(
        hidden_sizes=hidden_sizes,
        w_list=w_list, b_list=b_list,
        # fused / MXU-friendly forms (bf16 weights, f32 accumulation in-kernel)
        w_bd=w_bd.astype(jnp.bfloat16),
        b_cat=b_cat,
        fc1_w_p=fc1_w_p.astype(jnp.bfloat16),
        fc1_b=fc1_b,
        fc2_w_row=fc2_w.T,                    # (1, Hf) f32 row for lane-reduce
        fc2_b=fc2_b,
        # f32 originals for the reference
        fc1_w=fc1_w, fc2_w=fc2_w,
    )


def reference_forward(inputs, params):
    """Pure-JAX f32 replica of the torch forward for a correctness check."""
    outs = []
    for i, (w, b) in enumerate(zip(params["w_list"], params["b_list"])):
        outs.append(jnp.maximum(inputs[:, i, :] @ w + b, 0.0))
    cat = jnp.concatenate(outs, axis=1)
    hid = jnp.maximum(cat @ params["fc1_w"] + params["fc1_b"], 0.0)
    return hid @ params["fc2_w"] + params["fc2_b"]


# ---------------------------------------------------------------------------
if __name__ == "__main__":
    # small, forward-consistent shapes
    B = 2
    embedding_dim = 32
    FCNeurons_current = 16
    CONVNeurons_current = 8
    FCNeurons_history = 12
    CONVNeurons_history = 8
    num_final_hidden = 32

    key = jax.random.PRNGKey(0)
    pkey, xkey = jax.random.split(key)
    params = make_params(pkey, embedding_dim, FCNeurons_current,
                         CONVNeurons_current, FCNeurons_history,
                         CONVNeurons_history, num_final_hidden)

    inputs = jax.random.normal(xkey, (B, 24, embedding_dim), jnp.float32)

    out = multiview_forward(inputs, params)
    out = jax.block_until_ready(out)

    ref = reference_forward(inputs, params)
    assert out.shape == (B, 1)
    # tolerance loosened vs the f32 reference because weights/activations on
    # the MXU are bf16 (f32 accumulation retained)
    assert jnp.allclose(out, ref, rtol=5e-2, atol=5e-2), (out, ref)

    print("KERNEL_OK")
</pallas_src>

<mosaic_0001>
module attributes {stable_mosaic.version = 11 : i64} {
  func.func @_fused_kernel(%arg0: i32, %arg1: memref<2x768xbf16, #tpu.memory_space<vmem>>, %arg2: memref<768x256xbf16, #tpu.memory_space<vmem>>, %arg3: memref<1x256xf32, #tpu.memory_space<vmem>>, %arg4: memref<256x32xbf16, #tpu.memory_space<vmem>>, %arg5: memref<1x32xf32, #tpu.memory_space<vmem>>, %arg6: memref<1x32xf32, #tpu.memory_space<vmem>>, %arg7: memref<1x1xf32, #tpu.memory_space<smem>>, %arg8: memref<2x1xf32, #tpu.memory_space<vmem>>) attributes {dimension_semantics = [#tpu.dimension_semantics<parallel>], iteration_bounds = array<i64: 1>, scalar_prefetch = 0 : i64, scratch_operands = 0 : i64, tpu.core_type = #tpu.core_type<tc>, window_params = [{transform_indices = @transform_0, window_bounds = array<i64: 2, 768>}, {pipeline_mode = #tpu.pipeline_mode<synchronous>, transform_indices = @transform_1, window_bounds = array<i64: 768, 256>}, {pipeline_mode = #tpu.pipeline_mode<synchronous>, transform_indices = @transform_2, window_bounds = array<i64: 1, 256>}, {pipeline_mode = #tpu.pipeline_mode<synchronous>, transform_indices = @transform_3, window_bounds = array<i64: 256, 32>}, {pipeline_mode = #tpu.pipeline_mode<synchronous>, transform_indices = @transform_4, window_bounds = array<i64: 1, 32>}, {pipeline_mode = #tpu.pipeline_mode<synchronous>, transform_indices = @transform_5, window_bounds = array<i64: 1, 32>}, {transform_indices = @transform_6, window_bounds = array<i64: 1, 1>}, {transform_indices = @transform_7, window_bounds = array<i64: 2, 1>}]} {
    %c0 = arith.constant 0 : index
    %c0_0 = arith.constant 0 : index
    %0 = vector.load %arg1[%c0, %c0_0] : memref<2x768xbf16, #tpu.memory_space<vmem>>, vector<2x768xbf16>
    %c0_1 = arith.constant 0 : index
    %c0_2 = arith.constant 0 : index
    %1 = vector.load %arg2[%c0_1, %c0_2] : memref<768x256xbf16, #tpu.memory_space<vmem>>, vector<768x256xbf16>
    %cst = arith.constant dense<0.000000e+00> : vector<2x256xf32>
    %2 = tpu.matmul %0, %1, %cst {dimension_numbers = #tpu.dot_dimension_numbers<[1], [0], [0], [1], [0, 0, 1, 1], [], []>} : vector<2x768xbf16>, vector<768x256xbf16>, vector<2x256xf32> -> vector<2x256xf32>
    %c0_3 = arith.constant 0 : index
    %c0_4 = arith.constant 0 : index
    %3 = vector.load %arg3[%c0_3, %c0_4] : memref<1x256xf32, #tpu.memory_space<vmem>>, vector<1x256xf32>
    %4 = vector.broadcast %3 : vector<1x256xf32> to vector<2x256xf32>
    %5 = arith.addf %2, %4 : vector<2x256xf32>
    %cst_5 = arith.constant 0.000000e+00 : f32
    %6 = vector.broadcast %cst_5 : f32 to vector<2x256xf32>
    %7 = arith.maximumf %5, %6 : vector<2x256xf32>
    %8 = arith.truncf %7 : vector<2x256xf32> to vector<2x256xbf16>
    %c0_6 = arith.constant 0 : index
    %c0_7 = arith.constant 0 : index
    %9 = vector.load %arg4[%c0_6, %c0_7] : memref<256x32xbf16, #tpu.memory_space<vmem>>, vector<256x32xbf16>
    %cst_8 = arith.constant dense<0.000000e+00> : vector<2x32xf32>
    %10 = tpu.matmul %8, %9, %cst_8 {dimension_numbers = #tpu.dot_dimension_numbers<[1], [0], [0], [1], [0, 0, 1, 1], [], []>} : vector<2x256xbf16>, vector<256x32xbf16>, vector<2x32xf32> -> vector<2x32xf32>
    %c0_9 = arith.constant 0 : index
    %c0_10 = arith.constant 0 : index
    %11 = vector.load %arg5[%c0_9, %c0_10] : memref<1x32xf32, #tpu.memory_space<vmem>>, vector<1x32xf32>
    %12 = vector.broadcast %11 : vector<1x32xf32> to vector<2x32xf32>
    %13 = arith.addf %10, %12 : vector<2x32xf32>
    %cst_11 = arith.constant 0.000000e+00 : f32
    %14 = vector.broadcast %cst_11 : f32 to vector<2x32xf32>
    %15 = arith.maximumf %13, %14 : vector<2x32xf32>
    %c0_12 = arith.constant 0 : index
    %c0_13 = arith.constant 0 : index
    %16 = vector.load %arg6[%c0_12, %c0_13] : memref<1x32xf32, #tpu.memory_space<vmem>>, vector<1x32xf32>
    %17 = vector.broadcast %16 : vector<1x32xf32> to vector<2x32xf32>
    %18 = arith.mulf %15, %17 : vector<2x32xf32>
    %cst_14 = arith.constant dense<0.000000e+00> : vector<2xf32>
    %19 = vector.multi_reduction <add>, %18, %cst_14 [1] : vector<2x32xf32> to vector<2xf32>
    %20 = vector.shape_cast %19 : vector<2xf32> to vector<2x1xf32>
    %c0_15 = arith.constant 0 : index
    %c0_16 = arith.constant 0 : index
    %21 = memref.load %arg7[%c0_15, %c0_16] : memref<1x1xf32, #tpu.memory_space<smem>>
    %22 = vector.broadcast %21 : f32 to vector<2x1xf32>
    %23 = arith.addf %20, %22 : vector<2x1xf32>
    %c0_17 = arith.constant 0 : index
    %c0_18 = arith.constant 0 : index
    %24 = vector.load %arg8[%c0_17, %c0_18] : memref<2x1xf32, #tpu.memory_space<vmem>>, vector<2x1xf32>
    tpu.vector_store %arg8[%c0_17, %c0_18], %23 {strides = array<i32>} : memref<2x1xf32, #tpu.memory_space<vmem>>, vector<2x1xf32>,
    return
  }
  func.func @transform_0(%arg0: i32) -> (i32, i32) {
    %c0_i32 = arith.constant 0 : i32
    %c0_i32_0 = arith.constant 0 : i32
    return %arg0, %c0_i32 : i32, i32
  }
  func.func @transform_1(%arg0: i32) -> (i32, i32) {
    %c0_i32 = arith.constant 0 : i32
    %c0_i32_0 = arith.constant 0 : i32
    %c0_i32_1 = arith.constant 0 : i32
    return %c0_i32, %c0_i32_0 : i32, i32
  }
  func.func @transform_2(%arg0: i32) -> (i32, i32) {
    %c0_i32 = arith.constant 0 : i32
    %c0_i32_0 = arith.constant 0 : i32
    %c0_i32_1 = arith.constant 0 : i32
    return %c0_i32, %c0_i32_0 : i32, i32
  }
  func.func @transform_3(%arg0: i32) -> (i32, i32) {
    %c0_i32 = arith.constant 0 : i32
    %c0_i32_0 = arith.constant 0 : i32
    %c0_i32_1 = arith.constant 0 : i32
    return %c0_i32, %c0_i32_0 : i32, i32
  }
  func.func @transform_4(%arg0: i32) -> (i32, i32) {
    %c0_i32 = arith.constant 0 : i32
    %c0_i32_0 = arith.constant 0 : i32
    %c0_i32_1 = arith.constant 0 : i32
    return %c0_i32, %c0_i32_0 : i32, i32
  }
  func.func @transform_5(%arg0: i32) -> (i32, i32) {
    %c0_i32 = arith.constant 0 : i32
    %c0_i32_0 = arith.constant 0 : i32
    %c0_i32_1 = arith.constant 0 : i32
    return %c0_i32, %c0_i32_0 : i32, i32
  }
  func.func @transform_6(%arg0: i32) -> (i32, i32) {
    %c0_i32 = arith.constant 0 : i32
    %c0_i32_0 = arith.constant 0 : i32
    %c0_i32_1 = arith.constant 0 : i32
    return %c0_i32, %c0_i32_0 : i32, i32
  }
  func.func @transform_7(%arg0: i32) -> (i32, i32) {
    %c0_i32 = arith.constant 0 : i32
    %c0_i32_0 = arith.constant 0 : i32
    return %arg0, %c0_i32 : i32, i32
  }
}

module attributes {stable_mosaic.version = 11 : i64} {
  func.func @_fused_kernel(%arg0: i32, %arg1: memref<2x768xbf16, #tpu.memory_space<vmem>>, %arg2: memref<768x256xbf16, #tpu.memory_space<vmem>>, %arg3: memref<1x256xf32, #tpu.memory_space<vmem>>, %arg4: memref<256x32xbf16, #tpu.memory_space<vmem>>, %arg5: memref<1x32xf32, #tpu.memory_space<vmem>>, %arg6: memref<1x32xf32, #tpu.memory_space<vmem>>, %arg7: memref<1x1xf32, #tpu.memory_space<smem>>, %arg8: memref<2x1xf32, #tpu.memory_space<vmem>>) attributes {dimension_semantics = [#tpu.dimension_semantics<parallel>], iteration_bounds = array<i64: 1>, scalar_prefetch = 0 : i64, scratch_operands = 0 : i64, tpu.core_type = #tpu.core_type<tc>, window_params = [{transform_indices = @transform_0, window_bounds = array<i64: 2, 768>}, {pipeline_mode = #tpu.pipeline_mode<synchronous>, transform_indices = @transform_1, window_bounds = array<i64: 768, 256>}, {pipeline_mode = #tpu.pipeline_mode<synchronous>, transform_indices = @transform_2, window_bounds = array<i64: 1, 256>}, {pipeline_mode = #tpu.pipeline_mode<synchronous>, transform_indices = @transform_3, window_bounds = array<i64: 256, 32>}, {pipeline_mode = #tpu.pipeline_mode<synchronous>, transform_indices = @transform_4, window_bounds = array<i64: 1, 32>}, {pipeline_mode = #tpu.pipeline_mode<synchronous>, transform_indices = @transform_5, window_bounds = array<i64: 1, 32>}, {transform_indices = @transform_6, window_bounds = array<i64: 1, 1>}, {transform_indices = @transform_7, window_bounds = array<i64: 2, 1>}]} {
    %c0 = arith.constant 0 : index
    %c0_0 = arith.constant 0 : index
    %0 = vector.load %arg1[%c0, %c0_0] : memref<2x768xbf16, #tpu.memory_space<vmem>>, vector<2x768xbf16>
    %c0_1 = arith.constant 0 : index
    %c0_2 = arith.constant 0 : index
    %1 = vector.load %arg2[%c0_1, %c0_2] : memref<768x256xbf16, #tpu.memory_space<vmem>>, vector<768x256xbf16>
    %cst = arith.constant dense<0.000000e+00> : vector<2x256xf32>
    %2 = tpu.matmul %0, %1, %cst {dimension_numbers = #tpu.dot_dimension_numbers<[1], [0], [0], [1], [0, 0, 1, 1], [], []>} : vector<2x768xbf16>, vector<768x256xbf16>, vector<2x256xf32> -> vector<2x256xf32>
    %c0_3 = arith.constant 0 : index
    %c0_4 = arith.constant 0 : index
    %3 = vector.load %arg3[%c0_3, %c0_4] : memref<1x256xf32, #tpu.memory_space<vmem>>, vector<1x256xf32>
    %4 = vector.broadcast %3 : vector<1x256xf32> to vector<2x256xf32>
    %5 = arith.addf %2, %4 : vector<2x256xf32>
    %cst_5 = arith.constant 0.000000e+00 : f32
    %6 = vector.broadcast %cst_5 : f32 to vector<2x256xf32>
    %7 = arith.maximumf %5, %6 : vector<2x256xf32>
    %8 = arith.truncf %7 : vector<2x256xf32> to vector<2x256xbf16>
    %c0_6 = arith.constant 0 : index
    %c0_7 = arith.constant 0 : index
    %9 = vector.load %arg4[%c0_6, %c0_7] : memref<256x32xbf16, #tpu.memory_space<vmem>>, vector<256x32xbf16>
    %cst_8 = arith.constant dense<0.000000e+00> : vector<2x32xf32>
    %10 = tpu.matmul %8, %9, %cst_8 {dimension_numbers = #tpu.dot_dimension_numbers<[1], [0], [0], [1], [0, 0, 1, 1], [], []>} : vector<2x256xbf16>, vector<256x32xbf16>, vector<2x32xf32> -> vector<2x32xf32>
    %c0_9 = arith.constant 0 : index
    %c0_10 = arith.constant 0 : index
    %11 = vector.load %arg5[%c0_9, %c0_10] : memref<1x32xf32, #tpu.memory_space<vmem>>, vector<1x32xf32>
    %12 = vector.broadcast %11 : vector<1x32xf32> to vector<2x32xf32>
    %13 = arith.addf %10, %12 : vector<2x32xf32>
    %cst_11 = arith.constant 0.000000e+00 : f32
    %14 = vector.broadcast %cst_11 : f32 to vector<2x32xf32>
    %15 = arith.maximumf %13, %14 : vector<2x32xf32>
    %c0_12 = arith.constant 0 : index
    %c0_13 = arith.constant 0 : index
    %16 = vector.load %arg6[%c0_12, %c0_13] : memref<1x32xf32, #tpu.memory_space<vmem>>, vector<1x32xf32>
    %17 = vector.broadcast %16 : vector<1x32xf32> to vector<2x32xf32>
    %18 = arith.mulf %15, %17 : vector<2x32xf32>
    %cst_14 = arith.constant dense<0.000000e+00> : vector<2xf32>
    %19 = vector.multi_reduction <add>, %18, %cst_14 [1] : vector<2x32xf32> to vector<2xf32>
    %20 = vector.shape_cast %19 : vector<2xf32> to vector<2x1xf32>
    %c0_15 = arith.constant 0 : index
    %c0_16 = arith.constant 0 : index
    %21 = memref.load %arg7[%c0_15, %c0_16] : memref<1x1xf32, #tpu.memory_space<smem>>
    %22 = vector.broadcast %21 : f32 to vector<2x1xf32>
    %23 = arith.addf %20, %22 : vector<2x1xf32>
    %c0_17 = arith.constant 0 : index
    %c0_18 = arith.constant 0 : index
    %24 = vector.load %arg8[%c0_17, %c0_18] : memref<2x1xf32, #tpu.memory_space<vmem>>, vector<2x1xf32>
    tpu.vector_store %arg8[%c0_17, %c0_18], %23 {strides = array<i32>} : memref<2x1xf32, #tpu.memory_space<vmem>>, vector<2x1xf32>,
    return
  }
  func.func @transform_0(%arg0: i32) -> (i32, i32) {
    %c0_i32 = arith.constant 0 : i32
    %c0_i32_0 = arith.constant 0 : i32
    return %arg0, %c0_i32 : i32, i32
  }
  func.func @transform_1(%arg0: i32) -> (i32, i32) {
    %c0_i32 = arith.constant 0 : i32
    %c0_i32_0 = arith.constant 0 : i32
    %c0_i32_1 = arith.constant 0 : i32
    return %c0_i32, %c0_i32_0 : i32, i32
  }
  func.func @transform_2(%arg0: i32) -> (i32, i32) {
    %c0_i32 = arith.constant 0 : i32
    %c0_i32_0 = arith.constant 0 : i32
    %c0_i32_1 = arith.constant 0 : i32
    return %c0_i32, %c0_i32_0 : i32, i32
  }
  func.func @transform_3(%arg0: i32) -> (i32, i32) {
    %c0_i32 = arith.constant 0 : i32
    %c0_i32_0 = arith.constant 0 : i32
    %c0_i32_1 = arith.constant 0 : i32
    return %c0_i32, %c0_i32_0 : i32, i32
  }
  func.func @transform_4(%arg0: i32) -> (i32, i32) {
    %c0_i32 = arith.constant 0 : i32
    %c0_i32_0 = arith.constant 0 : i32
    %c0_i32_1 = arith.constant 0 : i32
    return %c0_i32, %c0_i32_0 : i32, i32
  }
  func.func @transform_5(%arg0: i32) -> (i32, i32) {
    %c0_i32 = arith.constant 0 : i32
    %c0_i32_0 = arith.constant 0 : i32
    %c0_i32_1 = arith.constant 0 : i32
    return %c0_i32, %c0_i32_0 : i32, i32
  }
  func.func @transform_6(%arg0: i32) -> (i32, i32) {
    %c0_i32 = arith.constant 0 : i32
    %c0_i32_0 = arith.constant 0 : i32
    %c0_i32_1 = arith.constant 0 : i32
    return %c0_i32, %c0_i32_0 : i32, i32
  }
  func.func @transform_7(%arg0: i32) -> (i32, i32) {
    %c0_i32 = arith.constant 0 : i32
    %c0_i32_0 = arith.constant 0 : i32
    return %arg0, %c0_i32 : i32, i32
  }
}

</mosaic_0001>

<bundles_post_ra>
// kernel: tpu_custom_call.1
= control target key start
LH: loop header
LB: loop body
LE: loop exit
PB: predicated region body
PF: predicated region fallthrough
CT: control target
= control target key end

     0   :  { %13 = vsyncpa [#allocation4], 0  ;;  %s1343_s24 = smov [#allocation3]   ;;  %s1491_s0 = inlined_call_operand.vmem [shape: bf16[2,768], index: 0, kind: input, shape index: {}]   ;;  %s1492_s1 = inlined_call_operand.hbm [shape: bf16[768,256], index: 1, kind: input, shape index: {}]   ;;  %s1493_s2 = inlined_call_operand.vmem [shape: f32[1,256], index: 2, kind: input, shape index: {}]   ;;  %s1494_s3 = inlined_call_operand.vmem [shape: bf16[256,32], index: 3, kind: input, shape index: {}]   ;;  %s1495_s4 = inlined_call_operand.vmem [shape: f32[1,32], index: 4, kind: input, shape index: {}]   ;;  %s1496_s5 = inlined_call_operand.vmem [shape: f32[1,32], index: 5, kind: input, shape index: {}]   ;;  %s1497_s6 = inlined_call_operand.<no memory space> [shape: f32[1,1], index: 6, kind: input, shape index: {}]   ;;  %s1498_s7 = inlined_call_operand.vmem [shape: f32[2,1], index: 7, kind: output, shape index: {}]  }
   0x1   :  { %s21_s25 = sshll.u32 %s1343_s24, 4  ;;  %s1319_s28 = scalar_lea.hbm %s1492_s1, 12288  ;;  %s22_s25 = int_to_ptr.vmem [resolvable:$true] %s21_s25 }
   0x2   :  { %p1320_p0 = scmp.ne.s32.totalorder %s1492_s1, %s1319_s28  ;;  %p1323_p1 = scmp.lt.u32.totalorder %s1319_s28, %s1492_s1 }
   0x4   :  { %p1325_p2 = pnand %p1323_p1, %p1320_p0 }
   0x6   :  { %1328 = shalt.err (!%p1325_p2)
}
   0x7   :  { %s1329_s10 = scalar_lea.vmem %s22_s25, 12288  ;;  %p1334_p4 = scmp.lt.s32.totalorder %s22_s25, %s22_s25 }
   0x8   :  { %p1330_p3 = scmp.ne.s32.totalorder %s22_s25, %s1329_s10  ;;  %p1335_p5 = scmp.lt.s32.totalorder %s1329_s10, %s1329_s10 }
   0xa   :  { %p1336_p6 = por %p1335_p5, %p1334_p4 }
   0xc   :  { %p1337_p7 = pnand %p1336_p6, %p1330_p3 }
   0xe   :  { %1340 = shalt.err (!%p1337_p7)
}
   0xf   :  { %s1344_s11 = smov 128   ;;  %s1345_s12 = smov 8  }
  0x10   :  { %27 = dma.hbm_to_vmem [thread:$0]  %s1492_s1, 12288, %s22_s25, [#allocation4], %s1344_s11, %s1344_s11, %s1345_s12  }
  0x11   :  { %1341 = dma.done.wait [#allocation4], 12288  }
  0x12   :  { %1342 = vsyncadd [#allocation4], 4294955008  ;;  %v1158_v0 = vld [vmem:[#allocation3 + $0x104] ss:$8 sps:$4 sm:$0xff]   ;;  %v1160_v1 = vld [vmem:[#allocation3 + $0x100] ss:$8 sps:$4 sm:$0xff]   ;;  %v141_v9 = vlaneseq }
  0x13   :  { %726 = vmatprep.subr.bf16.mxu0 %v1158_v0  ;;  %v1161_v2 = vld [vmem:[#allocation3 + $0x114] ss:$8 sps:$4 sm:$0xff]   ;;  %v1163_v3 = vld [vmem:[#allocation3 + $0x110] ss:$8 sps:$4 sm:$0xff]   ;;  %v1164_v4 = vld [vmem:[#allocation3 + $0x124] ss:$8 sps:$4 sm:$0xff]  }
  0x14   :  { %727 = vmatpush1.bf16.msra.mxu0 %v1160_v1  ;;  %v1166_v5 = vld [vmem:[#allocation3 + $0x120] ss:$8 sps:$4 sm:$0xff]   ;;  %v1167_v6 = vld [vmem:[#allocation3 + $0x134] ss:$8 sps:$4 sm:$0xff]   ;;  %v1169_v7 = vld [vmem:[#allocation3 + $0x130] ss:$8 sps:$4 sm:$0xff]  }
  0x15   :  { %728 = vmatprep.subr.bf16.mxu0 %v1161_v2  ;;  %v1170_v8 = vld [vmem:[#allocation3 + $0x144] ss:$8 sps:$4 sm:$0xff]   ;;  %v1346_v10 = vmov 1966171168   ;;  %v1172_v12 = vld [vmem:[#allocation3 + $0x140] ss:$8 sps:$4 sm:$0xff]  }
  0x16   :  { %v154_v11 = vunpack.c.l.s4 %v1346_v10  ;;  %v1173_v13 = vld [vmem:[#allocation3 + $0x154] ss:$8 sps:$4 sm:$0xff]   ;;  %v1399_v14 = vshrl.u32 %v141_v9, 7  ;;  %v1175_v16 = vld [vmem:[#allocation3 + $0x150] ss:$8 sps:$4 sm:$0xff]   ;;  %vm996_vm0 = vcmask 254976  }
  0x17   :  { %v1176_v17 = vld [vmem:[#allocation3 + $0x164] ss:$8 sps:$4 sm:$0xff]   ;;  %v1205_v19 = vld [vmem:[#allocation3] ss:$8 sps:$4 sm:$0xff]   ;;  %v1179_v22 = vld [vmem:[#allocation3 + $0x174] ss:$8 sps:$4 sm:$0xff]  }
  0x18   :  { %729 = vmatpush1.bf16.msra.mxu0 %v1163_v3  ;;  %v155_v15 = vunpack.c.0.s8 %v154_v11  ;;  %v1203_v18 = vld [vmem:[#allocation3 + $0x4] ss:$8 sps:$4 sm:$0xff]   ;;  %v1178_v21 = vld [vmem:[#allocation3 + $0x160] ss:$8 sps:$4 sm:$0xff]   ;;  %v1209_v23 = vld [vmem:[#allocation3 + $0x14] ss:$8 sps:$4 sm:$0xff]  }
  0x19   :  { %730 = vmatprep.subr.bf16.mxu0 %v1164_v4  ;;  %685 = vmatprep.subr.bf16.mxu1 %v1203_v18  ;;  %v1211_v24 = vld [vmem:[#allocation3 + $0x10] ss:$8 sps:$4 sm:$0xff]   ;;  %v42_v25 = vld [vmem:[%s1491_s0] sm:$0x3f]  ;;  %v1222_v35 = vld [vmem:[#allocation3 + $0x34] ss:$8 sps:$4 sm:$0xff]  }
  0x1a   :  { %v1402_v20 = vsub.s32 %v155_v15, %v1399_v14  ;;  %686 = vmatpush1.bf16.msra.mxu1 %v1205_v19  ;;  %v152_v26 = vcombine.high %v42_v25, %v42_v25  ;;  %v1181_v28 = vld [vmem:[#allocation3 + $0x170] ss:$8 sps:$4 sm:$0xff]   ;;  %v1216_v29 = vld [vmem:[#allocation3 + $0x24] ss:$8 sps:$4 sm:$0xff]   ;;  %v1218_v31 = vld [vmem:[#allocation3 + $0x20] ss:$8 sps:$4 sm:$0xff]  }
  0x1b   :  { %687 = vmatprep.subr.bf16.mxu1 %v1209_v23  ;;  %v1182_v33 = vld [vmem:[#allocation3 + $0x184] ss:$8 sps:$4 sm:$0xff]   ;;  %v1184_v37 = vld [vmem:[#allocation3 + $0x180] ss:$8 sps:$4 sm:$0xff]   ;;  %v1185_v38 = vld [vmem:[#allocation3 + $0x194] ss:$8 sps:$4 sm:$0xff]  }
  0x1c   :  { %731 = vmatpush1.bf16.msra.mxu0 %v1166_v5  ;;  %v1408_v27 = vrot.slane %v42_v25, %v1402_v20  ;;  %v1413_v32 = vrot.slane %v152_v26, %v1402_v20  ;;  %v1224_v40 = vld [vmem:[#allocation3 + $0x30] ss:$8 sps:$4 sm:$0xff]   ;;  %v1228_v41 = vld [vmem:[#allocation3 + $0x44] ss:$8 sps:$4 sm:$0xff]   ;;  %v1230_v44 = vld [vmem:[#allocation3 + $0x40] ss:$8 sps:$4 sm:$0xff]  }
  0x1d   :  { %732 = vmatprep.subr.bf16.mxu0 %v1167_v6  ;;  %v1187_v42 = vld [vmem:[#allocation3 + $0x190] ss:$8 sps:$4 sm:$0xff]   ;;  %v1188_v43 = vld [vmem:[#allocation3 + $0x1a4] ss:$8 sps:$4 sm:$0xff]   ;;  %v1234_v45 = vld [vmem:[#allocation3 + $0x54] ss:$8 sps:$4 sm:$0xff]  }
  0x1e   :  { %688 = vmatpush1.bf16.msra.mxu1 %v1211_v24  ;;  %v167_v30 = vcombine.high %v1408_v27, %v1408_v27  ;;  %v182_v36 = vrot.slane %v1413_v32, %v1402_v20  ;;  %v1190_v46 = vld [vmem:[#allocation3 + $0x1a0] ss:$8 sps:$4 sm:$0xff]   ;;  %v1191_v47 = vld [vmem:[#allocation3 + $0x1b4] ss:$8 sps:$4 sm:$0xff]   ;;  %v1236_v48 = vld [vmem:[#allocation3 + $0x50] ss:$8 sps:$4 sm:$0xff]   ;;  %v175_v4 = vrot.slane %v1408_v27, %v1402_v20 }
  0x1f   :  { %689 = vmatprep.subr.bf16.mxu1 %v1216_v29  ;;  %v1240_v49 = vld [vmem:[#allocation3 + $0x64] ss:$8 sps:$4 sm:$0xff]   ;;  %v1193_v50 = vld [vmem:[#allocation3 + $0x1b0] ss:$8 sps:$4 sm:$0xff]   ;;  %v1242_v52 = vld [vmem:[#allocation3 + $0x60] ss:$8 sps:$4 sm:$0xff]  }
  0x20   :  { %733 = vmatpush1.bf16.msra.mxu0 %v1169_v7  ;;  %v189_v34 = vrot.slane %v167_v30, %v1402_v20  ;;  %v1194_v51 = vld [vmem:[#allocation3 + $0x1c4] ss:$8 sps:$4 sm:$0xff]   ;;  %v1246_v53 = vld [vmem:[#allocation3 + $0x74] ss:$8 sps:$4 sm:$0xff]   ;;  %v1196_v54 = vld [vmem:[#allocation3 + $0x1c0] ss:$8 sps:$4 sm:$0xff]   ;;  %v168_v7 = vcombine.high %v1413_v32, %v1413_v32  ;;  %v197_v9 = vcombine.high %v175_v4, %v175_v4 }
  0x21   :  { %734 = vmatprep.subr.bf16.mxu0 %v1170_v8  ;;  %v1197_v55 = vld [vmem:[#allocation3 + $0x1d4] ss:$8 sps:$4 sm:$0xff]   ;;  %v1248_v56 = vld [vmem:[#allocation3 + $0x70] ss:$8 sps:$4 sm:$0xff]   ;;  %v1252_v57 = vld [vmem:[#allocation3 + $0x84] ss:$8 sps:$4 sm:$0xff]  }
  0x22   :  { %v198_v39 = vcombine.high %v189_v34, %v189_v34  ;;  %690 = vmatpush1.bf16.msra.mxu1 %v1218_v31  ;;  %717 = vmatprep.mubr.bf16.mxu1 %v189_v34  ;;  %v1199_v58 = vld [vmem:[#allocation3 + $0x1d0] ss:$8 sps:$4 sm:$0xff]   ;;  %v1200_v59 = vld [vmem:[#allocation3 + $0x1e4] ss:$8 sps:$4 sm:$0xff]   ;;  %v1254_v60 = vld [vmem:[#allocation3 + $0x80] ss:$8 sps:$4 sm:$0xff]   ;;  %v196_v15 = vrot.slane %v168_v7, %v1402_v20 }
  0x23   :  { %691 = vmatprep.subr.bf16.mxu1 %v1222_v35  ;;  %v1258_v61 = vld [vmem:[#allocation3 + $0x94] ss:$8 sps:$4 sm:$0xff]   ;;  %v1202_v62 = vld [vmem:[#allocation3 + $0x1e0] ss:$8 sps:$4 sm:$0xff]   ;;  %v1260_v0 = vld [vmem:[#allocation3 + $0x90] ss:$8 sps:$4 sm:$0xff]  }
  0x24   :  { %735 = vmatpush1.bf16.msra.mxu0 %v1172_v12  ;;  %758 = vmatprep.mubr.bf16.mxu0 %v198_v39  ;;  %v1206_v63 = vld [vmem:[#allocation3 + $0x1f4] ss:$8 sps:$4 sm:$0xff]   ;;  %v1264_v1 = vld [vmem:[#allocation3 + $0xa4] ss:$8 sps:$4 sm:$0xff]   ;;  %v1208_v2 = vld [vmem:[#allocation3 + $0x1f0] ss:$8 sps:$4 sm:$0xff]  }
  0x25   :  { %736 = vmatprep.subr.bf16.mxu0 %v1173_v13  ;;  %v1215_v3 = vld [vmem:[#allocation3 + $0x204] ss:$8 sps:$4 sm:$0xff]   ;;  %v1266_v5 = vld [vmem:[#allocation3 + $0xa0] ss:$8 sps:$4 sm:$0xff]   ;;  %v1270_v6 = vld [vmem:[#allocation3 + $0xb4] ss:$8 sps:$4 sm:$0xff]  }
  0x26   :  { %692 = vmatpush1.bf16.msra.mxu1 %v1224_v40  ;;  %v1213_v8 = vld [vmem:[#allocation3 + $0x200] ss:$8 sps:$4 sm:$0xff]   ;;  %v1221_v10 = vld [vmem:[#allocation3 + $0x214] ss:$8 sps:$4 sm:$0xff]   ;;  %v1272_v11 = vld [vmem:[#allocation3 + $0xb0] ss:$8 sps:$4 sm:$0xff]  }
  0x27   :  { %693 = vmatprep.subr.bf16.mxu1 %v1228_v41  ;;  %v1276_v12 = vld [vmem:[#allocation3 + $0xc4] ss:$8 sps:$4 sm:$0xff]   ;;  %v1219_v13 = vld [vmem:[#allocation3 + $0x210] ss:$8 sps:$4 sm:$0xff]   ;;  %v1282_v18 = vld [vmem:[#allocation3 + $0xd4] ss:$8 sps:$4 sm:$0xff]  }
  0x28   :  { %737 = vmatpush1.bf16.msra.mxu0 %v1175_v16  ;;  %v1227_v16 = vld [vmem:[#allocation3 + $0x224] ss:$8 sps:$4 sm:$0xff]   ;;  %v1225_v19 = vld [vmem:[#allocation3 + $0x220] ss:$8 sps:$4 sm:$0xff]   ;;  %v1231_v24 = vld [vmem:[#allocation3 + $0x230] ss:$8 sps:$4 sm:$0xff]  }
  0x29   :  { %738 = vmatprep.subr.bf16.mxu0 %v1176_v17  ;;  %v1278_v17 = vld [vmem:[#allocation3 + $0xc0] ss:$8 sps:$4 sm:$0xff]   ;;  %v1288_v23 = vld [vmem:[#allocation3 + $0xe4] ss:$8 sps:$4 sm:$0xff]   ;;  %v1294_v27 = vld [vmem:[#allocation3 + $0xf4] ss:$8 sps:$4 sm:$0xff]  }
  0x2a   :  { %694 = vmatpush1.bf16.msra.mxu1 %v1230_v44  ;;  %v1239_v25 = vld [vmem:[#allocation3 + $0x244] ss:$8 sps:$4 sm:$0xff]   ;;  %v1290_v26 = vld [vmem:[#allocation3 + $0xe0] ss:$8 sps:$4 sm:$0xff]   ;;  %v1296_v29 = vld [vmem:[#allocation3 + $0xf0] ss:$8 sps:$4 sm:$0xff]  }
  0x2b   :  { %695 = vmatprep.subr.bf16.mxu1 %v1234_v45  ;;  %v1245_v30 = vld [vmem:[#allocation3 + $0x254] ss:$8 sps:$4 sm:$0xff]   ;;  %v1303_v31 = vld [vmem:[%s1494_s3 + $0x40] sm:$0xff]   ;;  %v1306_v39 = vld [vmem:[%s1494_s3 + $0x8] sm:$0xff]   ;;  %v143_v7 = vsub.s32 0, %v1399_v14  ;;  %vm1003_vm1 = vcmask 1024  }
  0x2c   :  { %739 = vmatpush1.bf16.msra.mxu0 %v1178_v21  ;;  %v1233_v21 = vld [vmem:[#allocation3 + $0x234] ss:$8 sps:$4 sm:$0xff]   ;;  %v1304_v34 = vld [vmem:[%s1494_s3] sm:$0xff]  }
  0x2d   :  { %740 = vmatprep.subr.bf16.mxu0 %v1179_v22  ;;  %v1284_v22 = vld [vmem:[#allocation3 + $0xd0] ss:$8 sps:$4 sm:$0xff]   ;;  %v1251_v35 = vld [vmem:[#allocation3 + $0x264] ss:$8 sps:$4 sm:$0xff]   ;;  %v1257_v40 = vld [vmem:[#allocation3 + $0x274] ss:$8 sps:$4 sm:$0xff]  }
  0x2e   :  { %696 = vmatpush1.bf16.msra.mxu1 %v1236_v48  ;;  %v1307_v41 = vld [vmem:[%s1494_s3 + $0x50] sm:$0xff]   ;;  %v1263_v44 = vld [vmem:[#allocation3 + $0x284] ss:$8 sps:$4 sm:$0xff]   ;;  %v1309_v45 = vld [vmem:[%s1494_s3 + $0x58] sm:$0xff]  }
  0x2f   :  { %697 = vmatprep.subr.bf16.mxu1 %v1240_v49  ;;  %v1269_v48 = vld [vmem:[#allocation3 + $0x294] ss:$8 sps:$4 sm:$0xff]   ;;  %v1311_v49 = vld [vmem:[%s1494_s3 + $0x60] sm:$0xff]  }
  0x30   :  { %741 = vmatpush1.bf16.msra.mxu0 %v1181_v28  ;;  %v1237_v28 = vld [vmem:[#allocation3 + $0x240] ss:$8 sps:$4 sm:$0xff]   ;;  %v1317_v20 = vld [vmem:[%s1494_s3 + $0x78] sm:$0xff]  }
  0x31   :  { %742 = vmatprep.subr.bf16.mxu0 %v1182_v33  ;;  %v1243_v33 = vld [vmem:[#allocation3 + $0x250] ss:$8 sps:$4 sm:$0xff]  }
  0x32   :  { %698 = vmatpush1.bf16.msra.mxu1 %v1242_v52  ;;  %v1275_v52 = vld [vmem:[#allocation3 + $0x2a4] ss:$8 sps:$4 sm:$0xff]   ;;  %v1318_v32 = vld [vmem:[%s1494_s3 + $0x38] sm:$0xff]  }
  0x33   :  { %699 = vmatprep.subr.bf16.mxu1 %v1246_v53  ;;  %v1273_v53 = vld [vmem:[#allocation3 + $0x2a0] ss:$8 sps:$4 sm:$0xff]  }
  0x34   :  { %743 = vmatpush1.bf16.msra.mxu0 %v1184_v37  ;;  %v1305_v37 = vld [vmem:[%s1494_s3 + $0x48] sm:$0xff]  }
  0x35   :  { %744 = vmatprep.subr.bf16.mxu0 %v1185_v38  ;;  %v1249_v38 = vld [vmem:[#allocation3 + $0x260] ss:$8 sps:$4 sm:$0xff]  }
  0x36   :  { %700 = vmatpush1.bf16.msra.mxu1 %v1248_v56  ;;  %v1287_v56 = vld [vmem:[#allocation3 + $0x2c4] ss:$8 sps:$4 sm:$0xff]  }
  0x37   :  { %701 = vmatprep.subr.bf16.mxu1 %v1252_v57  ;;  %v1285_v57 = vld [vmem:[#allocation3 + $0x2c0] ss:$8 sps:$4 sm:$0xff]  }
  0x38   :  { %745 = vmatpush1.bf16.msra.mxu0 %v1187_v42  ;;  %v1255_v42 = vld [vmem:[#allocation3 + $0x270] ss:$8 sps:$4 sm:$0xff]  }
  0x39   :  { %746 = vmatprep.subr.bf16.mxu0 %v1188_v43  ;;  %v1308_v43 = vld [vmem:[%s1494_s3 + $0x10] sm:$0xff]  }
  0x3a   :  { %702 = vmatpush1.bf16.msra.mxu1 %v1254_v60  ;;  %v1299_v60 = vld [vmem:[#allocation3 + $0x2e4] ss:$8 sps:$4 sm:$0xff]  }
  0x3b   :  { %703 = vmatprep.subr.bf16.mxu1 %v1258_v61  ;;  %v1297_v61 = vld [vmem:[#allocation3 + $0x2e0] ss:$8 sps:$4 sm:$0xff]  }
  0x3c   :  { %747 = vmatpush1.bf16.msra.mxu0 %v1190_v46  ;;  %v1261_v46 = vld [vmem:[#allocation3 + $0x280] ss:$8 sps:$4 sm:$0xff]  }
  0x3d   :  { %748 = vmatprep.subr.bf16.mxu0 %v1191_v47  ;;  %v1310_v47 = vld [vmem:[%s1494_s3 + $0x18] sm:$0xff]  }
  0x3e   :  { %704 = vmatpush1.bf16.msra.mxu1 %v1260_v0  ;;  %v1313_v0 = vld [vmem:[%s1494_s3 + $0x68] sm:$0xff]  }
  0x3f   :  { %705 = vmatprep.subr.bf16.mxu1 %v1264_v1  ;;  %v1314_v1 = vld [vmem:[%s1494_s3 + $0x28] sm:$0xff]  }
  0x40   :  { %749 = vmatpush1.bf16.msra.mxu0 %v1193_v50  ;;  %v1267_v50 = vld [vmem:[#allocation3 + $0x290] ss:$8 sps:$4 sm:$0xff]  }
  0x41   :  { %750 = vmatprep.subr.bf16.mxu0 %v1194_v51  ;;  %v1312_v51 = vld [vmem:[%s1494_s3 + $0x20] sm:$0xff]  }
  0x42   :  { %706 = vmatpush1.bf16.msra.mxu1 %v1266_v5 }
  0x43   :  { %707 = vmatprep.subr.bf16.mxu1 %v1270_v6 }
  0x44   :  { %751 = vmatpush1.bf16.msra.mxu0 %v1196_v54  ;;  %v1281_v54 = vld [vmem:[#allocation3 + $0x2b4] ss:$8 sps:$4 sm:$0xff]  }
  0x45   :  { %752 = vmatprep.subr.bf16.mxu0 %v1197_v55  ;;  %v1279_v55 = vld [vmem:[#allocation3 + $0x2b0] ss:$8 sps:$4 sm:$0xff]  }
  0x46   :  { %708 = vmatpush1.bf16.msra.mxu1 %v1272_v11 }
  0x47   :  { %709 = vmatprep.subr.bf16.mxu1 %v1276_v12 }
  0x48   :  { %753 = vmatpush1.bf16.msra.mxu0 %v1199_v58  ;;  %v1293_v58 = vld [vmem:[#allocation3 + $0x2d4] ss:$8 sps:$4 sm:$0xff]  }
  0x49   :  { %754 = vmatprep.subr.bf16.mxu0 %v1200_v59  ;;  %v1291_v59 = vld [vmem:[#allocation3 + $0x2d0] ss:$8 sps:$4 sm:$0xff]  }
  0x4a   :  { %710 = vmatpush1.bf16.msra.mxu1 %v1278_v17 }
  0x4b   :  { %711 = vmatprep.subr.bf16.mxu1 %v1282_v18 }
  0x4c   :  { %755 = vmatpush1.bf16.msra.mxu0 %v1202_v62  ;;  %v1302_v62 = vld [vmem:[#allocation3 + $0x2f4] ss:$8 sps:$4 sm:$0xff]  }
  0x4d   :  { %756 = vmatprep.subr.bf16.mxu0 %v1206_v63  ;;  %v1300_v63 = vld [vmem:[#allocation3 + $0x2f0] ss:$8 sps:$4 sm:$0xff]  }
  0x4e   :  { %712 = vmatpush1.bf16.msra.mxu1 %v1284_v22 }
  0x4f   :  { %713 = vmatprep.subr.bf16.mxu1 %v1288_v23 }
  0x50   :  { %757 = vmatpush1.bf16.msra.mxu0 %v1208_v2  ;;  %v1315_v2 = vld [vmem:[%s1494_s3 + $0x70] sm:$0xff]  }
  0x51   :  { %767 = vmatprep.subr.bf16.mxu0 %v1215_v3  ;;  %v1316_v3 = vld [vmem:[%s1494_s3 + $0x30] sm:$0xff]  }
  0x52   :  { %714 = vmatpush1.bf16.msra.mxu1 %v1290_v26 }
  0x53   :  { %759 = vmatmul.mubr.bf16.vlgmr.msra.gmra.mrb[0].mxu0 %v197_v9  ;;  %715 = vmatprep.subr.bf16.mxu1 %v1294_v27  ;;  %v147_v9 = vsub.s32 1, %v1399_v14  ;;  %v1106_v14 = vld [vmem:[%s1495_s4] ss:$0 sm:$0xff] }
  0x54   :  { %768 = vmatpush1.bf16.msra.mxu0 %v1213_v8  ;;  %799 = vmatprep.mubr.bf16.mxu0 %v196_v15  ;;  %v139_v8 = vld [vmem:[%s1493_s2] sm:$0x3] }
  0x55   :  { %769 = vmatprep.subr.bf16.mxu0 %v1221_v10  ;;  %v144_v10 = vrot.slane %v139_v8, %v143_v7  ;;  %v148_v11 = vrot.slane %v139_v8, %v147_v9 }
  0x56   :  { %716 = vmatpush1.bf16.msra.mxu1 %v1296_v29 }
  0x57   :  { %1124 = vmatprep.subr.bf16.mxu1 %v1303_v31 }
  0x58   :  { %770 = vmatpush1.bf16.msra.mxu0 %v1219_v13 }
  0x59   :  { %771 = vmatprep.subr.bf16.mxu0 %v1227_v16  ;;  %718 = vmatmul.mubr.bf16.vlgmr.msra.gmra.mrb[0].mxu1 %v175_v4 }
  0x5a   :  { %1125 = vmatpush3.bf16.msra.mxu1 %v1304_v34 }
  0x5b   :  { %1126 = vmatprep.subr.bf16.mxu1 %v1305_v37 }
  0x5c   :  { %772 = vmatpush1.bf16.msra.mxu0 %v1225_v19 }
  0x5d   :  { %773 = vmatprep.subr.bf16.mxu0 %v1233_v21 }
  0x5e   :  { %1127 = vmatpush3.bf16.msra.mxu1 %v1306_v39 }
  0x5f   :  { %1128 = vmatprep.subr.bf16.mxu1 %v1307_v41 }
  0x60   :  { %774 = vmatpush1.bf16.msra.mxu0 %v1231_v24 }
  0x61   :  { %775 = vmatprep.subr.bf16.mxu0 %v1239_v25 }
  0x62   :  { %1129 = vmatpush3.bf16.msra.mxu1 %v1308_v43 }
  0x63   :  { %1130 = vmatprep.subr.bf16.mxu1 %v1309_v45 }
  0x64   :  { %776 = vmatpush1.bf16.msra.mxu0 %v1237_v28 }
  0x65   :  { %777 = vmatprep.subr.bf16.mxu0 %v1245_v30 }
  0x66   :  { %1131 = vmatpush3.bf16.msra.mxu1 %v1310_v47 }
  0x67   :  { %1132 = vmatprep.subr.bf16.mxu1 %v1311_v49 }
  0x68   :  { %778 = vmatpush1.bf16.msra.mxu0 %v1243_v33  ;;  %v1123_v33 = vld [vmem:[%s1496_s5] ss:$0 sm:$0xff] }
  0x69   :  { %779 = vmatprep.subr.bf16.mxu0 %v1251_v35 }
  0x6a   :  { %1133 = vmatpush3.bf16.msra.mxu1 %v1312_v51 }
  0x6b   :  { %1134 = vmatprep.subr.bf16.mxu1 %v1313_v0 }
  0x6c   :  { %780 = vmatpush1.bf16.msra.mxu0 %v1249_v38  ;;  %v1001_v38 = vstv %s1497_s6 }
  0x6d   :  { %781 = vmatprep.subr.bf16.mxu0 %v1257_v40 }
  0x6e   :  { %1135 = vmatpush3.bf16.msra.mxu1 %v1314_v1 }
  0x6f   :  { %1136 = vmatprep.subr.bf16.mxu1 %v1315_v2 }
  0x70   :  { %782 = vmatpush1.bf16.msra.mxu0 %v1255_v42 }
  0x71   :  { %783 = vmatprep.subr.bf16.mxu0 %v1263_v44 }
  0x72   :  { %1137 = vmatpush3.bf16.msra.mxu1 %v1316_v3 }
  0x73   :  { %1138 = vmatprep.subr.bf16.mxu1 %v1317_v20 }
  0x74   :  { %784 = vmatpush1.bf16.msra.mxu0 %v1261_v46 }
  0x75   :  { %785 = vmatprep.subr.bf16.mxu0 %v1269_v48 }
  0x76   :  { %1139 = vmatpush3.bf16.msra.mxu1 %v1318_v32 }
  0x78   :  { %786 = vmatpush1.bf16.msra.mxu0 %v1267_v50 }
  0x79   :  { %787 = vmatprep.subr.bf16.mxu0 %v1275_v52 }
  0x7c   :  { %788 = vmatpush1.bf16.msra.mxu0 %v1273_v53 }
  0x7d   :  { %789 = vmatprep.subr.bf16.mxu0 %v1281_v54 }
  0x80   :  { %790 = vmatpush1.bf16.msra.mxu0 %v1279_v55 }
  0x81   :  { %791 = vmatprep.subr.bf16.mxu0 %v1287_v56 }
  0x84   :  { %792 = vmatpush1.bf16.msra.mxu0 %v1285_v57 }
  0x85   :  { %793 = vmatprep.subr.bf16.mxu0 %v1293_v58 }
  0x88   :  { %794 = vmatpush1.bf16.msra.mxu0 %v1291_v59 }
  0x89   :  { %795 = vmatprep.subr.bf16.mxu0 %v1299_v60 }
  0x8c   :  { %796 = vmatpush1.bf16.msra.mxu0 %v1297_v61 }
  0x8d   :  { %797 = vmatprep.subr.bf16.mxu0 %v1302_v62 }
  0x90   :  { %798 = vmatpush1.bf16.msra.mxu0 %v1300_v63 }
  0x93   :  { %800 = vmatmul.mubr.bf16.vlgmr.msra.gmra.mrb[0].mxu0 %v182_v36 }
 0x12c   :  { %v719_v36 = vpop.f32.mrb[0].mxu1 }
 0x12d   :  { %v721_v4 = vpop.f32.mrb[1].mxu1  ;;  %v720_v12 = vadd.f32 %v719_v36, %v144_v10 }
 0x12e   :  { %v723_v5 = vpop.f32.mrb[2].mxu1  ;;  %v722_v13 = vadd.f32 %v721_v4, %v148_v11 }
 0x12f   :  { %v724_v6 = vpop.f32.mrb[3].mxu1 }
 0x166   :  { %v801_v15 = vpop.f32.mrb[0].mxu0 }
 0x167   :  { %v1147_v16 = vadd.f32 %v801_v15, %v720_v12  ;;  %v803_v17 = vpop.f32.mrb[1].mxu0 }
 0x168   :  { %v1149_v18 = vadd.f32 %v803_v17, %v722_v13  ;;  %v805_v19 = vpop.f32.mrb[2].mxu0 }
 0x169   :  { %v808_v21 = vmax.f32 %v1147_v16, 0.0  ;;  %v806_v22 = vpop.f32.mrb[3].mxu0 }
 0x16a   :  { %v809_v23 = vmax.f32 %v1149_v18, 0.0 }
 0x16b   :  { %v810_v25 = vpack.c.bf16 %v808_v21, %v808_v21 }
 0x16c   :  { %v811_v24 = vpack.c.bf16 %v809_v23, %v809_v23 }
 0x16e   :  { %979 = vmatprep.mubr.bf16.mxu1 %v811_v24 }
 0x16f   :  { %980 = vmatmul.mubr.bf16.vlgmr.msra.gmra.mrb[4].mxu1 %v810_v25 }
 0x242   :  { %v1140_v26 = vpop.f32.mrb[4].mxu1 }
 0x243   :  { %v1141_v27 = vpop.f32.mrb[5].mxu1 }
 0x244   :  { %v1142_v28 = vadd.f32 %v1141_v27, %v1140_v26  ;;  %v1143_v29 = vpop.f32.mrb[6].mxu1 }
 0x245   :  { %v1144_v30 = vpop.f32.mrb[7].mxu1 }
 0x246   :  { %v982_v31 = vadd.f32 %v1142_v28, %v1106_v14 }
 0x248   :  { %v987_v34 = vmax.f32 %v982_v31, 0.0 }
 0x24a   :  { %v995_v35 = vmul.f32 %v1123_v33, %v987_v34 }
 0x24c   :  { %v997_v37 = vsel %vm996_vm0, %v995_v35, 0.0 }
 0x24d   :  { %998 = vadd.xlane.f32.xlu0 %v997_v37 }
 0x2da   :  { %v999_v39 = vpop.xlane.xlu0 %998 }
 0x2db   :  { %v1002_v40 = vadd.f32 %v1001_v38, %v999_v39 }
 0x2dd   :  { %1004 = vst.msk [vmem:[%s1498_s7] sm:$0x3] %vm1003_vm1, %v1002_v40 }
 0x2de   :  { %1009 = vsyncpa [#allocation4], 1 }

// kernel: tpu_custom_call.1
= control target key start
LH: loop header
LB: loop body
LE: loop exit
PB: predicated region body
PF: predicated region fallthrough
CT: control target
= control target key end

     0   :  { %13 = vsyncpa [#allocation4], 0  ;;  %s1343_s24 = smov [#allocation3]   ;;  %s1491_s0 = inlined_call_operand.vmem [shape: bf16[2,768], index: 0, kind: input, shape index: {}]   ;;  %s1492_s1 = inlined_call_operand.hbm [shape: bf16[768,256], index: 1, kind: input, shape index: {}]   ;;  %s1493_s2 = inlined_call_operand.vmem [shape: f32[1,256], index: 2, kind: input, shape index: {}]   ;;  %s1494_s3 = inlined_call_operand.vmem [shape: bf16[256,32], index: 3, kind: input, shape index: {}]   ;;  %s1495_s4 = inlined_call_operand.vmem [shape: f32[1,32], index: 4, kind: input, shape index: {}]   ;;  %s1496_s5 = inlined_call_operand.vmem [shape: f32[1,32], index: 5, kind: input, shape index: {}]   ;;  %s1497_s6 = inlined_call_operand.<no memory space> [shape: f32[1,1], index: 6, kind: input, shape index: {}]   ;;  %s1498_s7 = inlined_call_operand.vmem [shape: f32[2,1], index: 7, kind: output, shape index: {}]  }
   0x1   :  { %s21_s25 = sshll.u32 %s1343_s24, 4  ;;  %s1319_s28 = scalar_lea.hbm %s1492_s1, 12288  ;;  %s22_s25 = int_to_ptr.vmem [resolvable:$true] %s21_s25 }
   0x2   :  { %p1320_p0 = scmp.ne.s32.totalorder %s1492_s1, %s1319_s28  ;;  %p1323_p1 = scmp.lt.u32.totalorder %s1319_s28, %s1492_s1 }
   0x4   :  { %p1325_p2 = pnand %p1323_p1, %p1320_p0 }
   0x6   :  { %1328 = shalt.err (!%p1325_p2)
}
   0x7   :  { %s1329_s10 = scalar_lea.vmem %s22_s25, 12288  ;;  %p1334_p4 = scmp.lt.s32.totalorder %s22_s25, %s22_s25 }
   0x8   :  { %p1330_p3 = scmp.ne.s32.totalorder %s22_s25, %s1329_s10  ;;  %p1335_p5 = scmp.lt.s32.totalorder %s1329_s10, %s1329_s10 }
   0xa   :  { %p1336_p6 = por %p1335_p5, %p1334_p4 }
   0xc   :  { %p1337_p7 = pnand %p1336_p6, %p1330_p3 }
   0xe   :  { %1340 = shalt.err (!%p1337_p7)
}
   0xf   :  { %s1344_s11 = smov 128   ;;  %s1345_s12 = smov 8  }
  0x10   :  { %27 = dma.hbm_to_vmem [thread:$0]  %s1492_s1, 12288, %s22_s25, [#allocation4], %s1344_s11, %s1344_s11, %s1345_s12  }
  0x11   :  { %1341 = dma.done.wait [#allocation4], 12288  }
  0x12   :  { %1342 = vsyncadd [#allocation4], 4294955008  ;;  %v1158_v0 = vld [vmem:[#allocation3 + $0x104] ss:$8 sps:$4 sm:$0xff]   ;;  %v1160_v1 = vld [vmem:[#allocation3 + $0x100] ss:$8 sps:$4 sm:$0xff]   ;;  %v141_v9 = vlaneseq }
  0x13   :  { %726 = vmatprep.subr.bf16.mxu0 %v1158_v0  ;;  %v1161_v2 = vld [vmem:[#allocation3 + $0x114] ss:$8 sps:$4 sm:$0xff]   ;;  %v1163_v3 = vld [vmem:[#allocation3 + $0x110] ss:$8 sps:$4 sm:$0xff]   ;;  %v1164_v4 = vld [vmem:[#allocation3 + $0x124] ss:$8 sps:$4 sm:$0xff]  }
  0x14   :  { %727 = vmatpush1.bf16.msra.mxu0 %v1160_v1  ;;  %v1166_v5 = vld [vmem:[#allocation3 + $0x120] ss:$8 sps:$4 sm:$0xff]   ;;  %v1167_v6 = vld [vmem:[#allocation3 + $0x134] ss:$8 sps:$4 sm:$0xff]   ;;  %v1169_v7 = vld [vmem:[#allocation3 + $0x130] ss:$8 sps:$4 sm:$0xff]  }
  0x15   :  { %728 = vmatprep.subr.bf16.mxu0 %v1161_v2  ;;  %v1170_v8 = vld [vmem:[#allocation3 + $0x144] ss:$8 sps:$4 sm:$0xff]   ;;  %v1346_v10 = vmov 1966171168   ;;  %v1172_v12 = vld [vmem:[#allocation3 + $0x140] ss:$8 sps:$4 sm:$0xff]  }
  0x16   :  { %v154_v11 = vunpack.c.l.s4 %v1346_v10  ;;  %v1173_v13 = vld [vmem:[#allocation3 + $0x154] ss:$8 sps:$4 sm:$0xff]   ;;  %v1399_v14 = vshrl.u32 %v141_v9, 7  ;;  %v1175_v16 = vld [vmem:[#allocation3 + $0x150] ss:$8 sps:$4 sm:$0xff]   ;;  %vm996_vm0 = vcmask 254976  }
  0x17   :  { %v1176_v17 = vld [vmem:[#allocation3 + $0x164] ss:$8 sps:$4 sm:$0xff]   ;;  %v1205_v19 = vld [vmem:[#allocation3] ss:$8 sps:$4 sm:$0xff]   ;;  %v1179_v22 = vld [vmem:[#allocation3 + $0x174] ss:$8 sps:$4 sm:$0xff]  }
  0x18   :  { %729 = vmatpush1.bf16.msra.mxu0 %v1163_v3  ;;  %v155_v15 = vunpack.c.0.s8 %v154_v11  ;;  %v1203_v18 = vld [vmem:[#allocation3 + $0x4] ss:$8 sps:$4 sm:$0xff]   ;;  %v1178_v21 = vld [vmem:[#allocation3 + $0x160] ss:$8 sps:$4 sm:$0xff]   ;;  %v1209_v23 = vld [vmem:[#allocation3 + $0x14] ss:$8 sps:$4 sm:$0xff]  }
  0x19   :  { %730 = vmatprep.subr.bf16.mxu0 %v1164_v4  ;;  %685 = vmatprep.subr.bf16.mxu1 %v1203_v18  ;;  %v1211_v24 = vld [vmem:[#allocation3 + $0x10] ss:$8 sps:$4 sm:$0xff]   ;;  %v42_v25 = vld [vmem:[%s1491_s0] sm:$0x3f]  ;;  %v1222_v35 = vld [vmem:[#allocation3 + $0x34] ss:$8 sps:$4 sm:$0xff]  }
  0x1a   :  { %v1402_v20 = vsub.s32 %v155_v15, %v1399_v14  ;;  %686 = vmatpush1.bf16.msra.mxu1 %v1205_v19  ;;  %v152_v26 = vcombine.high %v42_v25, %v42_v25  ;;  %v1181_v28 = vld [vmem:[#allocation3 + $0x170] ss:$8 sps:$4 sm:$0xff]   ;;  %v1216_v29 = vld [vmem:[#allocation3 + $0x24] ss:$8 sps:$4 sm:$0xff]   ;;  %v1218_v31 = vld [vmem:[#allocation3 + $0x20] ss:$8 sps:$4 sm:$0xff]  }
  0x1b   :  { %687 = vmatprep.subr.bf16.mxu1 %v1209_v23  ;;  %v1182_v33 = vld [vmem:[#allocation3 + $0x184] ss:$8 sps:$4 sm:$0xff]   ;;  %v1184_v37 = vld [vmem:[#allocation3 + $0x180] ss:$8 sps:$4 sm:$0xff]   ;;  %v1185_v38 = vld [vmem:[#allocation3 + $0x194] ss:$8 sps:$4 sm:$0xff]  }
  0x1c   :  { %731 = vmatpush1.bf16.msra.mxu0 %v1166_v5  ;;  %v1408_v27 = vrot.slane %v42_v25, %v1402_v20  ;;  %v1413_v32 = vrot.slane %v152_v26, %v1402_v20  ;;  %v1224_v40 = vld [vmem:[#allocation3 + $0x30] ss:$8 sps:$4 sm:$0xff]   ;;  %v1228_v41 = vld [vmem:[#allocation3 + $0x44] ss:$8 sps:$4 sm:$0xff]   ;;  %v1230_v44 = vld [vmem:[#allocation3 + $0x40] ss:$8 sps:$4 sm:$0xff]  }
  0x1d   :  { %732 = vmatprep.subr.bf16.mxu0 %v1167_v6  ;;  %v1187_v42 = vld [vmem:[#allocation3 + $0x190] ss:$8 sps:$4 sm:$0xff]   ;;  %v1188_v43 = vld [vmem:[#allocation3 + $0x1a4] ss:$8 sps:$4 sm:$0xff]   ;;  %v1234_v45 = vld [vmem:[#allocation3 + $0x54] ss:$8 sps:$4 sm:$0xff]  }
  0x1e   :  { %688 = vmatpush1.bf16.msra.mxu1 %v1211_v24  ;;  %v167_v30 = vcombine.high %v1408_v27, %v1408_v27  ;;  %v182_v36 = vrot.slane %v1413_v32, %v1402_v20  ;;  %v1190_v46 = vld [vmem:[#allocation3 + $0x1a0] ss:$8 sps:$4 sm:$0xff]   ;;  %v1191_v47 = vld [vmem:[#allocation3 + $0x1b4] ss:$8 sps:$4 sm:$0xff]   ;;  %v1236_v48 = vld [vmem:[#allocation3 + $0x50] ss:$8 sps:$4 sm:$0xff]   ;;  %v175_v4 = vrot.slane %v1408_v27, %v1402_v20 }
  0x1f   :  { %689 = vmatprep.subr.bf16.mxu1 %v1216_v29  ;;  %v1240_v49 = vld [vmem:[#allocation3 + $0x64] ss:$8 sps:$4 sm:$0xff]   ;;  %v1193_v50 = vld [vmem:[#allocation3 + $0x1b0] ss:$8 sps:$4 sm:$0xff]   ;;  %v1242_v52 = vld [vmem:[#allocation3 + $0x60] ss:$8 sps:$4 sm:$0xff]  }
  0x20   :  { %733 = vmatpush1.bf16.msra.mxu0 %v1169_v7  ;;  %v189_v34 = vrot.slane %v167_v30, %v1402_v20  ;;  %v1194_v51 = vld [vmem:[#allocation3 + $0x1c4] ss:$8 sps:$4 sm:$0xff]   ;;  %v1246_v53 = vld [vmem:[#allocation3 + $0x74] ss:$8 sps:$4 sm:$0xff]   ;;  %v1196_v54 = vld [vmem:[#allocation3 + $0x1c0] ss:$8 sps:$4 sm:$0xff]   ;;  %v168_v7 = vcombine.high %v1413_v32, %v1413_v32  ;;  %v197_v9 = vcombine.high %v175_v4, %v175_v4 }
  0x21   :  { %734 = vmatprep.subr.bf16.mxu0 %v1170_v8  ;;  %v1197_v55 = vld [vmem:[#allocation3 + $0x1d4] ss:$8 sps:$4 sm:$0xff]   ;;  %v1248_v56 = vld [vmem:[#allocation3 + $0x70] ss:$8 sps:$4 sm:$0xff]   ;;  %v1252_v57 = vld [vmem:[#allocation3 + $0x84] ss:$8 sps:$4 sm:$0xff]  }
  0x22   :  { %v198_v39 = vcombine.high %v189_v34, %v189_v34  ;;  %690 = vmatpush1.bf16.msra.mxu1 %v1218_v31  ;;  %717 = vmatprep.mubr.bf16.mxu1 %v189_v34  ;;  %v1199_v58 = vld [vmem:[#allocation3 + $0x1d0] ss:$8 sps:$4 sm:$0xff]   ;;  %v1200_v59 = vld [vmem:[#allocation3 + $0x1e4] ss:$8 sps:$4 sm:$0xff]   ;;  %v1254_v60 = vld [vmem:[#allocation3 + $0x80] ss:$8 sps:$4 sm:$0xff]   ;;  %v196_v15 = vrot.slane %v168_v7, %v1402_v20 }
  0x23   :  { %691 = vmatprep.subr.bf16.mxu1 %v1222_v35  ;;  %v1258_v61 = vld [vmem:[#allocation3 + $0x94] ss:$8 sps:$4 sm:$0xff]   ;;  %v1202_v62 = vld [vmem:[#allocation3 + $0x1e0] ss:$8 sps:$4 sm:$0xff]   ;;  %v1260_v0 = vld [vmem:[#allocation3 + $0x90] ss:$8 sps:$4 sm:$0xff]  }
  0x24   :  { %735 = vmatpush1.bf16.msra.mxu0 %v1172_v12  ;;  %758 = vmatprep.mubr.bf16.mxu0 %v198_v39  ;;  %v1206_v63 = vld [vmem:[#allocation3 + $0x1f4] ss:$8 sps:$4 sm:$0xff]   ;;  %v1264_v1 = vld [vmem:[#allocation3 + $0xa4] ss:$8 sps:$4 sm:$0xff]   ;;  %v1208_v2 = vld [vmem:[#allocation3 + $0x1f0] ss:$8 sps:$4 sm:$0xff]  }
  0x25   :  { %736 = vmatprep.subr.bf16.mxu0 %v1173_v13  ;;  %v1215_v3 = vld [vmem:[#allocation3 + $0x204] ss:$8 sps:$4 sm:$0xff]   ;;  %v1266_v5 = vld [vmem:[#allocation3 + $0xa0] ss:$8 sps:$4 sm:$0xff]   ;;  %v1270_v6 = vld [vmem:[#allocation3 + $0xb4] ss:$8 sps:$4 sm:$0xff]  }
  0x26   :  { %692 = vmatpush1.bf16.msra.mxu1 %v1224_v40  ;;  %v1213_v8 = vld [vmem:[#allocation3 + $0x200] ss:$8 sps:$4 sm:$0xff]   ;;  %v1221_v10 = vld [vmem:[#allocation3 + $0x214] ss:$8 sps:$4 sm:$0xff]   ;;  %v1272_v11 = vld [vmem:[#allocation3 + $0xb0] ss:$8 sps:$4 sm:$0xff]  }
  0x27   :  { %693 = vmatprep.subr.bf16.mxu1 %v1228_v41  ;;  %v1276_v12 = vld [vmem:[#allocation3 + $0xc4] ss:$8 sps:$4 sm:$0xff]   ;;  %v1219_v13 = vld [vmem:[#allocation3 + $0x210] ss:$8 sps:$4 sm:$0xff]   ;;  %v1282_v18 = vld [vmem:[#allocation3 + $0xd4] ss:$8 sps:$4 sm:$0xff]  }
  0x28   :  { %737 = vmatpush1.bf16.msra.mxu0 %v1175_v16  ;;  %v1227_v16 = vld [vmem:[#allocation3 + $0x224] ss:$8 sps:$4 sm:$0xff]   ;;  %v1225_v19 = vld [vmem:[#allocation3 + $0x220] ss:$8 sps:$4 sm:$0xff]   ;;  %v1231_v24 = vld [vmem:[#allocation3 + $0x230] ss:$8 sps:$4 sm:$0xff]  }
  0x29   :  { %738 = vmatprep.subr.bf16.mxu0 %v1176_v17  ;;  %v1278_v17 = vld [vmem:[#allocation3 + $0xc0] ss:$8 sps:$4 sm:$0xff]   ;;  %v1288_v23 = vld [vmem:[#allocation3 + $0xe4] ss:$8 sps:$4 sm:$0xff]   ;;  %v1294_v27 = vld [vmem:[#allocation3 + $0xf4] ss:$8 sps:$4 sm:$0xff]  }
  0x2a   :  { %694 = vmatpush1.bf16.msra.mxu1 %v1230_v44  ;;  %v1239_v25 = vld [vmem:[#allocation3 + $0x244] ss:$8 sps:$4 sm:$0xff]   ;;  %v1290_v26 = vld [vmem:[#allocation3 + $0xe0] ss:$8 sps:$4 sm:$0xff]   ;;  %v1296_v29 = vld [vmem:[#allocation3 + $0xf0] ss:$8 sps:$4 sm:$0xff]  }
  0x2b   :  { %695 = vmatprep.subr.bf16.mxu1 %v1234_v45  ;;  %v1245_v30 = vld [vmem:[#allocation3 + $0x254] ss:$8 sps:$4 sm:$0xff]   ;;  %v1303_v31 = vld [vmem:[%s1494_s3 + $0x40] sm:$0xff]   ;;  %v1306_v39 = vld [vmem:[%s1494_s3 + $0x8] sm:$0xff]   ;;  %v143_v7 = vsub.s32 0, %v1399_v14  ;;  %vm1003_vm1 = vcmask 1024  }
  0x2c   :  { %739 = vmatpush1.bf16.msra.mxu0 %v1178_v21  ;;  %v1233_v21 = vld [vmem:[#allocation3 + $0x234] ss:$8 sps:$4 sm:$0xff]   ;;  %v1304_v34 = vld [vmem:[%s1494_s3] sm:$0xff]  }
  0x2d   :  { %740 = vmatprep.subr.bf16.mxu0 %v1179_v22  ;;  %v1284_v22 = vld [vmem:[#allocation3 + $0xd0] ss:$8 sps:$4 sm:$0xff]   ;;  %v1251_v35 = vld [vmem:[#allocation3 + $0x264] ss:$8 sps:$4 sm:$0xff]   ;;  %v1257_v40 = vld [vmem:[#allocation3 + $0x274] ss:$8 sps:$4 sm:$0xff]  }
  0x2e   :  { %696 = vmatpush1.bf16.msra.mxu1 %v1236_v48  ;;  %v1307_v41 = vld [vmem:[%s1494_s3 + $0x50] sm:$0xff]   ;;  %v1263_v44 = vld [vmem:[#allocation3 + $0x284] ss:$8 sps:$4 sm:$0xff]   ;;  %v1309_v45 = vld [vmem:[%s1494_s3 + $0x58] sm:$0xff]  }
  0x2f   :  { %697 = vmatprep.subr.bf16.mxu1 %v1240_v49  ;;  %v1269_v48 = vld [vmem:[#allocation3 + $0x294] ss:$8 sps:$4 sm:$0xff]   ;;  %v1311_v49 = vld [vmem:[%s1494_s3 + $0x60] sm:$0xff]  }
  0x30   :  { %741 = vmatpush1.bf16.msra.mxu0 %v1181_v28  ;;  %v1237_v28 = vld [vmem:[#allocation3 + $0x240] ss:$8 sps:$4 sm:$0xff]   ;;  %v1317_v20 = vld [vmem:[%s1494_s3 + $0x78] sm:$0xff]  }
  0x31   :  { %742 = vmatprep.subr.bf16.mxu0 %v1182_v33  ;;  %v1243_v33 = vld [vmem:[#allocation3 + $0x250] ss:$8 sps:$4 sm:$0xff]  }
  0x32   :  { %698 = vmatpush1.bf16.msra.mxu1 %v1242_v52  ;;  %v1275_v52 = vld [vmem:[#allocation3 + $0x2a4] ss:$8 sps:$4 sm:$0xff]   ;;  %v1318_v32 = vld [vmem:[%s1494_s3 + $0x38] sm:$0xff]  }
  0x33   :  { %699 = vmatprep.subr.bf16.mxu1 %v1246_v53  ;;  %v1273_v53 = vld [vmem:[#allocation3 + $0x2a0] ss:$8 sps:$4 sm:$0xff]  }
  0x34   :  { %743 = vmatpush1.bf16.msra.mxu0 %v1184_v37  ;;  %v1305_v37 = vld [vmem:[%s1494_s3 + $0x48] sm:$0xff]  }
  0x35   :  { %744 = vmatprep.subr.bf16.mxu0 %v1185_v38  ;;  %v1249_v38 = vld [vmem:[#allocation3 + $0x260] ss:$8 sps:$4 sm:$0xff]  }
  0x36   :  { %700 = vmatpush1.bf16.msra.mxu1 %v1248_v56  ;;  %v1287_v56 = vld [vmem:[#allocation3 + $0x2c4] ss:$8 sps:$4 sm:$0xff]  }
  0x37   :  { %701 = vmatprep.subr.bf16.mxu1 %v1252_v57  ;;  %v1285_v57 = vld [vmem:[#allocation3 + $0x2c0] ss:$8 sps:$4 sm:$0xff]  }
  0x38   :  { %745 = vmatpush1.bf16.msra.mxu0 %v1187_v42  ;;  %v1255_v42 = vld [vmem:[#allocation3 + $0x270] ss:$8 sps:$4 sm:$0xff]  }
  0x39   :  { %746 = vmatprep.subr.bf16.mxu0 %v1188_v43  ;;  %v1308_v43 = vld [vmem:[%s1494_s3 + $0x10] sm:$0xff]  }
  0x3a   :  { %702 = vmatpush1.bf16.msra.mxu1 %v1254_v60  ;;  %v1299_v60 = vld [vmem:[#allocation3 + $0x2e4] ss:$8 sps:$4 sm:$0xff]  }
  0x3b   :  { %703 = vmatprep.subr.bf16.mxu1 %v1258_v61  ;;  %v1297_v61 = vld [vmem:[#allocation3 + $0x2e0] ss:$8 sps:$4 sm:$0xff]  }
  0x3c   :  { %747 = vmatpush1.bf16.msra.mxu0 %v1190_v46  ;;  %v1261_v46 = vld [vmem:[#allocation3 + $0x280] ss:$8 sps:$4 sm:$0xff]  }
  0x3d   :  { %748 = vmatprep.subr.bf16.mxu0 %v1191_v47  ;;  %v1310_v47 = vld [vmem:[%s1494_s3 + $0x18] sm:$0xff]  }
  0x3e   :  { %704 = vmatpush1.bf16.msra.mxu1 %v1260_v0  ;;  %v1313_v0 = vld [vmem:[%s1494_s3 + $0x68] sm:$0xff]  }
  0x3f   :  { %705 = vmatprep.subr.bf16.mxu1 %v1264_v1  ;;  %v1314_v1 = vld [vmem:[%s1494_s3 + $0x28] sm:$0xff]  }
  0x40   :  { %749 = vmatpush1.bf16.msra.mxu0 %v1193_v50  ;;  %v1267_v50 = vld [vmem:[#allocation3 + $0x290] ss:$8 sps:$4 sm:$0xff]  }
  0x41   :  { %750 = vmatprep.subr.bf16.mxu0 %v1194_v51  ;;  %v1312_v51 = vld [vmem:[%s1494_s3 + $0x20] sm:$0xff]  }
  0x42   :  { %706 = vmatpush1.bf16.msra.mxu1 %v1266_v5 }
  0x43   :  { %707 = vmatprep.subr.bf16.mxu1 %v1270_v6 }
  0x44   :  { %751 = vmatpush1.bf16.msra.mxu0 %v1196_v54  ;;  %v1281_v54 = vld [vmem:[#allocation3 + $0x2b4] ss:$8 sps:$4 sm:$0xff]  }
  0x45   :  { %752 = vmatprep.subr.bf16.mxu0 %v1197_v55  ;;  %v1279_v55 = vld [vmem:[#allocation3 + $0x2b0] ss:$8 sps:$4 sm:$0xff]  }
  0x46   :  { %708 = vmatpush1.bf16.msra.mxu1 %v1272_v11 }
  0x47   :  { %709 = vmatprep.subr.bf16.mxu1 %v1276_v12 }
  0x48   :  { %753 = vmatpush1.bf16.msra.mxu0 %v1199_v58  ;;  %v1293_v58 = vld [vmem:[#allocation3 + $0x2d4] ss:$8 sps:$4 sm:$0xff]  }
  0x49   :  { %754 = vmatprep.subr.bf16.mxu0 %v1200_v59  ;;  %v1291_v59 = vld [vmem:[#allocation3 + $0x2d0] ss:$8 sps:$4 sm:$0xff]  }
  0x4a   :  { %710 = vmatpush1.bf16.msra.mxu1 %v1278_v17 }
  0x4b   :  { %711 = vmatprep.subr.bf16.mxu1 %v1282_v18 }
  0x4c   :  { %755 = vmatpush1.bf16.msra.mxu0 %v1202_v62  ;;  %v1302_v62 = vld [vmem:[#allocation3 + $0x2f4] ss:$8 sps:$4 sm:$0xff]  }
  0x4d   :  { %756 = vmatprep.subr.bf16.mxu0 %v1206_v63  ;;  %v1300_v63 = vld [vmem:[#allocation3 + $0x2f0] ss:$8 sps:$4 sm:$0xff]  }
  0x4e   :  { %712 = vmatpush1.bf16.msra.mxu1 %v1284_v22 }
  0x4f   :  { %713 = vmatprep.subr.bf16.mxu1 %v1288_v23 }
  0x50   :  { %757 = vmatpush1.bf16.msra.mxu0 %v1208_v2  ;;  %v1315_v2 = vld [vmem:[%s1494_s3 + $0x70] sm:$0xff]  }
  0x51   :  { %767 = vmatprep.subr.bf16.mxu0 %v1215_v3  ;;  %v1316_v3 = vld [vmem:[%s1494_s3 + $0x30] sm:$0xff]  }
  0x52   :  { %714 = vmatpush1.bf16.msra.mxu1 %v1290_v26 }
  0x53   :  { %759 = vmatmul.mubr.bf16.vlgmr.msra.gmra.mrb[0].mxu0 %v197_v9  ;;  %715 = vmatprep.subr.bf16.mxu1 %v1294_v27  ;;  %v147_v9 = vsub.s32 1, %v1399_v14  ;;  %v1106_v14 = vld [vmem:[%s1495_s4] ss:$0 sm:$0xff] }
  0x54   :  { %768 = vmatpush1.bf16.msra.mxu0 %v1213_v8  ;;  %799 = vmatprep.mubr.bf16.mxu0 %v196_v15  ;;  %v139_v8 = vld [vmem:[%s1493_s2] sm:$0x3] }
  0x55   :  { %769 = vmatprep.subr.bf16.mxu0 %v1221_v10  ;;  %v144_v10 = vrot.slane %v139_v8, %v143_v7  ;;  %v148_v11 = vrot.slane %v139_v8, %v147_v9 }
  0x56   :  { %716 = vmatpush1.bf16.msra.mxu1 %v1296_v29 }
  0x57   :  { %1124 = vmatprep.subr.bf16.mxu1 %v1303_v31 }
  0x58   :  { %770 = vmatpush1.bf16.msra.mxu0 %v1219_v13 }
  0x59   :  { %771 = vmatprep.subr.bf16.mxu0 %v1227_v16  ;;  %718 = vmatmul.mubr.bf16.vlgmr.msra.gmra.mrb[0].mxu1 %v175_v4 }
  0x5a   :  { %1125 = vmatpush3.bf16.msra.mxu1 %v1304_v34 }
  0x5b   :  { %1126 = vmatprep.subr.bf16.mxu1 %v1305_v37 }
  0x5c   :  { %772 = vmatpush1.bf16.msra.mxu0 %v1225_v19 }
  0x5d   :  { %773 = vmatprep.subr.bf16.mxu0 %v1233_v21 }
  0x5e   :  { %1127 = vmatpush3.bf16.msra.mxu1 %v1306_v39 }
  0x5f   :  { %1128 = vmatprep.subr.bf16.mxu1 %v1307_v41 }
  0x60   :  { %774 = vmatpush1.bf16.msra.mxu0 %v1231_v24 }
  0x61   :  { %775 = vmatprep.subr.bf16.mxu0 %v1239_v25 }
  0x62   :  { %1129 = vmatpush3.bf16.msra.mxu1 %v1308_v43 }
  0x63   :  { %1130 = vmatprep.subr.bf16.mxu1 %v1309_v45 }
  0x64   :  { %776 = vmatpush1.bf16.msra.mxu0 %v1237_v28 }
  0x65   :  { %777 = vmatprep.subr.bf16.mxu0 %v1245_v30 }
  0x66   :  { %1131 = vmatpush3.bf16.msra.mxu1 %v1310_v47 }
  0x67   :  { %1132 = vmatprep.subr.bf16.mxu1 %v1311_v49 }
  0x68   :  { %778 = vmatpush1.bf16.msra.mxu0 %v1243_v33  ;;  %v1123_v33 = vld [vmem:[%s1496_s5] ss:$0 sm:$0xff] }
  0x69   :  { %779 = vmatprep.subr.bf16.mxu0 %v1251_v35 }
  0x6a   :  { %1133 = vmatpush3.bf16.msra.mxu1 %v1312_v51 }
  0x6b   :  { %1134 = vmatprep.subr.bf16.mxu1 %v1313_v0 }
  0x6c   :  { %780 = vmatpush1.bf16.msra.mxu0 %v1249_v38  ;;  %v1001_v38 = vstv %s1497_s6 }
  0x6d   :  { %781 = vmatprep.subr.bf16.mxu0 %v1257_v40 }
  0x6e   :  { %1135 = vmatpush3.bf16.msra.mxu1 %v1314_v1 }
  0x6f   :  { %1136 = vmatprep.subr.bf16.mxu1 %v1315_v2 }
  0x70   :  { %782 = vmatpush1.bf16.msra.mxu0 %v1255_v42 }
  0x71   :  { %783 = vmatprep.subr.bf16.mxu0 %v1263_v44 }
  0x72   :  { %1137 = vmatpush3.bf16.msra.mxu1 %v1316_v3 }
  0x73   :  { %1138 = vmatprep.subr.bf16.mxu1 %v1317_v20 }
  0x74   :  { %784 = vmatpush1.bf16.msra.mxu0 %v1261_v46 }
  0x75   :  { %785 = vmatprep.subr.bf16.mxu0 %v1269_v48 }
  0x76   :  { %1139 = vmatpush3.bf16.msra.mxu1 %v1318_v32 }
  0x78   :  { %786 = vmatpush1.bf16.msra.mxu0 %v1267_v50 }
  0x79   :  { %787 = vmatprep.subr.bf16.mxu0 %v1275_v52 }
  0x7c   :  { %788 = vmatpush1.bf16.msra.mxu0 %v1273_v53 }
  0x7d   :  { %789 = vmatprep.subr.bf16.mxu0 %v1281_v54 }
  0x80   :  { %790 = vmatpush1.bf16.msra.mxu0 %v1279_v55 }
  0x81   :  { %791 = vmatprep.subr.bf16.mxu0 %v1287_v56 }
  0x84   :  { %792 = vmatpush1.bf16.msra.mxu0 %v1285_v57 }
  0x85   :  { %793 = vmatprep.subr.bf16.mxu0 %v1293_v58 }
  0x88   :  { %794 = vmatpush1.bf16.msra.mxu0 %v1291_v59 }
  0x89   :  { %795 = vmatprep.subr.bf16.mxu0 %v1299_v60 }
  0x8c   :  { %796 = vmatpush1.bf16.msra.mxu0 %v1297_v61 }
  0x8d   :  { %797 = vmatprep.subr.bf16.mxu0 %v1302_v62 }
  0x90   :  { %798 = vmatpush1.bf16.msra.mxu0 %v1300_v63 }
  0x93   :  { %800 = vmatmul.mubr.bf16.vlgmr.msra.gmra.mrb[0].mxu0 %v182_v36 }
 0x12c   :  { %v719_v36 = vpop.f32.mrb[0].mxu1 }
 0x12d   :  { %v721_v4 = vpop.f32.mrb[1].mxu1  ;;  %v720_v12 = vadd.f32 %v719_v36, %v144_v10 }
 0x12e   :  { %v723_v5 = vpop.f32.mrb[2].mxu1  ;;  %v722_v13 = vadd.f32 %v721_v4, %v148_v11 }
 0x12f   :  { %v724_v6 = vpop.f32.mrb[3].mxu1 }
 0x166   :  { %v801_v15 = vpop.f32.mrb[0].mxu0 }
 0x167   :  { %v1147_v16 = vadd.f32 %v801_v15, %v720_v12  ;;  %v803_v17 = vpop.f32.mrb[1].mxu0 }
 0x168   :  { %v1149_v18 = vadd.f32 %v803_v17, %v722_v13  ;;  %v805_v19 = vpop.f32.mrb[2].mxu0 }
 0x169   :  { %v808_v21 = vmax.f32 %v1147_v16, 0.0  ;;  %v806_v22 = vpop.f32.mrb[3].mxu0 }
 0x16a   :  { %v809_v23 = vmax.f32 %v1149_v18, 0.0 }
 0x16b   :  { %v810_v25 = vpack.c.bf16 %v808_v21, %v808_v21 }
 0x16c   :  { %v811_v24 = vpack.c.bf16 %v809_v23, %v809_v23 }
 0x16e   :  { %979 = vmatprep.mubr.bf16.mxu1 %v811_v24 }
 0x16f   :  { %980 = vmatmul.mubr.bf16.vlgmr.msra.gmra.mrb[4].mxu1 %v810_v25 }
 0x242   :  { %v1140_v26 = vpop.f32.mrb[4].mxu1 }
 0x243   :  { %v1141_v27 = vpop.f32.mrb[5].mxu1 }
 0x244   :  { %v1142_v28 = vadd.f32 %v1141_v27, %v1140_v26  ;;  %v1143_v29 = vpop.f32.mrb[6].mxu1 }
 0x245   :  { %v1144_v30 = vpop.f32.mrb[7].mxu1 }
 0x246   :  { %v982_v31 = vadd.f32 %v1142_v28, %v1106_v14 }
 0x248   :  { %v987_v34 = vmax.f32 %v982_v31, 0.0 }
 0x24a   :  { %v995_v35 = vmul.f32 %v1123_v33, %v987_v34 }
 0x24c   :  { %v997_v37 = vsel %vm996_vm0, %v995_v35, 0.0 }
 0x24d   :  { %998 = vadd.xlane.f32.xlu0 %v997_v37 }
 0x2da   :  { %v999_v39 = vpop.xlane.xlu0 %998 }
 0x2db   :  { %v1002_v40 = vadd.f32 %v1001_v38, %v999_v39 }
 0x2dd   :  { %1004 = vst.msk [vmem:[%s1498_s7] sm:$0x3] %vm1003_vm1, %v1002_v40 }
 0x2de   :  { %1009 = vsyncpa [#allocation4], 1 }

</bundles_post_ra>
